<compile_context>
chip_gen: v7x
topology: tpu7x:2x2x1
jax: 0.10.0
libtpu: 0.0.40
codegen_flags: <defaults>
</compile_context>

<pallas_src>
import functools

import jax
import jax.numpy as jnp
from jax import lax
from jax.experimental import pallas as pl
from jax.experimental.pallas import tpu as pltpu

# Hyperparameters implied by the module (chosen small & consistent).
EMBEDDING_DIMENSIONS = 32   # c
HEAD_SIZE = 16              # head_size
BLOCK_SIZE = 8              # block_size (== T here)
BATCH = 2
SEQ = 8                     # t  (t <= block_size)


def _attn_kernel(x_ref, wk_ref, wv_ref, o_ref, *, seq_len):
    # x_ref:  (T, C)  one batch element (leading batch dim squeezed by BlockSpec)
    # wk_ref: (C, H)  key weight, pre-scaled by C**-0.25 in the wrapper
    # wv_ref: (C, H)  value weight
    # o_ref:  (T, H)
    #
    # Matmul operands in bf16 for the MXU fast path; accumulation and all
    # softmax / masking math in f32 on the VPU.
    x = x_ref[...].astype(jnp.bfloat16)
    wk = wk_ref[...].astype(jnp.bfloat16)
    wv = wv_ref[...].astype(jnp.bfloat16)

    k = jnp.dot(x, wk, preferred_element_type=jnp.float32)   # (T, H) f32
    v = jnp.dot(x, wv, preferred_element_type=jnp.float32)   # (T, H) f32
    # Reference quirk: q = self.key(x) -> q is bit-identical to k; reuse it.
    kb = k.astype(jnp.bfloat16)

    # NT contraction (no explicit transpose). The C**-0.5 softmax scale is
    # already folded into wk (C**-0.25 on each of q and k), so no score scale.
    score = lax.dot_general(
        kb, kb, (((1,), (1,)), ((), ())),
        preferred_element_type=jnp.float32)                   # (T, T) f32

    # Causal (tril) mask for this batch element, built in-kernel.
    rows = lax.broadcasted_iota(jnp.int32, (seq_len, seq_len), 0)
    cols = lax.broadcasted_iota(jnp.int32, (seq_len, seq_len), 1)
    # Large finite negative instead of -inf: identical softmax result (the
    # diagonal is always kept, so no fully-masked row) and no exp(-inf) NaNs.
    score = jnp.where(rows >= cols, score, jnp.float32(-1e30))

    # Numerically stable softmax over the last axis (f32).
    m = jnp.max(score, axis=-1, keepdims=True)
    e = jnp.exp(score - m)
    s = jnp.sum(e, axis=-1, keepdims=True)
    p = e * pl.reciprocal(s, approx=True)       # EUP reciprocal; ~free slot

    out = jnp.dot(p.astype(jnp.bfloat16), v.astype(jnp.bfloat16),
                  preferred_element_type=jnp.float32)          # (T, H) f32
    o_ref[...] = out.astype(o_ref.dtype)


def single_head_attention(x, w_key, w_value):
    """x: (B, T, C); w_key, w_value: (C, H). Returns (B, T, H)."""
    B, T, C = x.shape
    H = w_key.shape[1]

    # Fold the softmax scale into the key weight. q = k = x @ (w_key * C**-0.25),
    # so q @ k.T carries exactly the C**-0.5 factor of the reference.
    wk_scaled = w_key * (float(C) ** -0.25)

    kernel = functools.partial(_attn_kernel, seq_len=T)

    return pl.pallas_call(
        kernel,
        out_shape=jax.ShapeDtypeStruct((B, T, H), x.dtype),
        grid=(B,),
        in_specs=[
            # One batch element per grid step; batch dim squeezed out.
            pl.BlockSpec((None, T, C), lambda b: (b, 0, 0)),
            # Small weights: whole-array blocks, resident across the grid.
            pl.BlockSpec((C, H), lambda b: (0, 0)),
            pl.BlockSpec((C, H), lambda b: (0, 0)),
        ],
        out_specs=pl.BlockSpec((None, T, H), lambda b: (b, 0, 0)),
        compiler_params=pltpu.CompilerParams(
            # Independent batch axis -> shard across the 2 TCs on v7x.
            dimension_semantics=("parallel",),
        ),
    )(x, wk_scaled, w_value)


if __name__ == "__main__":
    key = jax.random.PRNGKey(0)
    kx, kk, kv = jax.random.split(key, 3)

    x = jax.random.normal(kx, (BATCH, SEQ, EMBEDDING_DIMENSIONS), dtype=jnp.float32)
    # Deterministic parameter init (nn.Linear-style uniform bound).
    bound = 1.0 / (EMBEDDING_DIMENSIONS ** 0.5)
    w_key = jax.random.uniform(kk, (EMBEDDING_DIMENSIONS, HEAD_SIZE),
                               minval=-bound, maxval=bound, dtype=jnp.float32)
    w_value = jax.random.uniform(kv, (EMBEDDING_DIMENSIONS, HEAD_SIZE),
                                 minval=-bound, maxval=bound, dtype=jnp.float32)

    out = single_head_attention(x, w_key, w_value)
    out = jax.block_until_ready(out)

    # Pure-JAX f32 reference mirroring the PyTorch forward exactly.
    tril = jnp.tril(jnp.ones((BLOCK_SIZE, BLOCK_SIZE), dtype=jnp.float32))
    k_ref = x @ w_key
    q_ref = x @ w_key
    v_ref = x @ w_value
    s_ref = (q_ref @ jnp.swapaxes(k_ref, -2, -1)) * (EMBEDDING_DIMENSIONS ** -0.5)
    s_ref = jnp.where(tril[:SEQ, :SEQ] == 0.0, -jnp.inf, s_ref)
    p_ref = jax.nn.softmax(s_ref, axis=-1)
    ref = p_ref @ v_ref

    # Tolerance covers bf16 matmul operands (f32 accumulation) and the EUP
    # approximate reciprocal in the softmax normalize.
    assert jnp.allclose(out, ref, atol=5e-2, rtol=5e-2), "mismatch vs reference"

    print("KERNEL_OK")
</pallas_src>

<mosaic_0001>
module attributes {stable_mosaic.version = 11 : i64} {
  func.func @_attn_kernel(%arg0: i32, %arg1: memref<1x8x32xf32, #tpu.memory_space<vmem>>, %arg2: memref<32x16xf32, #tpu.memory_space<vmem>>, %arg3: memref<32x16xf32, #tpu.memory_space<vmem>>, %arg4: memref<1x8x16xf32, #tpu.memory_space<vmem>>) attributes {dimension_semantics = [#tpu.dimension_semantics<parallel>], iteration_bounds = array<i64: 2>, scalar_prefetch = 0 : i64, scratch_operands = 0 : i64, tpu.core_type = #tpu.core_type<tc>, window_params = [{transform_indices = @transform_0, window_bounds = array<i64: 1, 8, 32>}, {pipeline_mode = #tpu.pipeline_mode<synchronous>, transform_indices = @transform_1, window_bounds = array<i64: 32, 16>}, {pipeline_mode = #tpu.pipeline_mode<synchronous>, transform_indices = @transform_2, window_bounds = array<i64: 32, 16>}, {transform_indices = @transform_3, window_bounds = array<i64: 1, 8, 16>}]} {
    %c0 = arith.constant 0 : index
    %c0_0 = arith.constant 0 : index
    %c0_1 = arith.constant 0 : index
    %0 = vector.load %arg1[%c0, %c0_0, %c0_1] : memref<1x8x32xf32, #tpu.memory_space<vmem>>, vector<1x8x32xf32>
    %1 = vector.shape_cast %0 : vector<1x8x32xf32> to vector<8x32xf32>
    %2 = arith.truncf %1 : vector<8x32xf32> to vector<8x32xbf16>
    %c0_2 = arith.constant 0 : index
    %c0_3 = arith.constant 0 : index
    %3 = vector.load %arg2[%c0_2, %c0_3] : memref<32x16xf32, #tpu.memory_space<vmem>>, vector<32x16xf32>
    %4 = arith.truncf %3 : vector<32x16xf32> to vector<32x16xbf16>
    %c0_4 = arith.constant 0 : index
    %c0_5 = arith.constant 0 : index
    %5 = vector.load %arg3[%c0_4, %c0_5] : memref<32x16xf32, #tpu.memory_space<vmem>>, vector<32x16xf32>
    %6 = arith.truncf %5 : vector<32x16xf32> to vector<32x16xbf16>
    %cst = arith.constant dense<0.000000e+00> : vector<8x16xf32>
    %7 = tpu.matmul %2, %4, %cst {dimension_numbers = #tpu.dot_dimension_numbers<[1], [0], [0], [1], [0, 0, 1, 1], [], []>} : vector<8x32xbf16>, vector<32x16xbf16>, vector<8x16xf32> -> vector<8x16xf32>
    %cst_6 = arith.constant dense<0.000000e+00> : vector<8x16xf32>
    %8 = tpu.matmul %2, %6, %cst_6 {dimension_numbers = #tpu.dot_dimension_numbers<[1], [0], [0], [1], [0, 0, 1, 1], [], []>} : vector<8x32xbf16>, vector<32x16xbf16>, vector<8x16xf32> -> vector<8x16xf32>
    %9 = arith.truncf %7 : vector<8x16xf32> to vector<8x16xbf16>
    %cst_7 = arith.constant dense<0.000000e+00> : vector<8x8xf32>
    %10 = tpu.matmul %9, %9, %cst_7 {dimension_numbers = #tpu.dot_dimension_numbers<[1], [1], [0], [0], [0, 0, 1, 0], [], []>} : vector<8x16xbf16>, vector<8x16xbf16>, vector<8x8xf32> -> vector<8x8xf32>
    %11 = tpu.iota {dimensions = array<i32: 0>} : vector<8x8xi32>
    %12 = tpu.iota {dimensions = array<i32: 1>} : vector<8x8xi32>
    %13 = arith.cmpi sge, %11, %12 : vector<8x8xi32>
    %cst_8 = arith.constant -1.000000e+30 : f32
    %14 = vector.broadcast %cst_8 : f32 to vector<8x8xf32>
    %15 = arith.select %13, %10, %14 : vector<8x8xi1>, vector<8x8xf32>
    %cst_9 = arith.constant dense<0xFF800000> : vector<8xf32>
    %16 = vector.multi_reduction <maximumf>, %15, %cst_9 [1] : vector<8x8xf32> to vector<8xf32>
    %17 = vector.shape_cast %16 : vector<8xf32> to vector<8x1xf32>
    %18 = vector.broadcast %17 : vector<8x1xf32> to vector<8x8xf32>
    %19 = arith.subf %15, %18 : vector<8x8xf32>
    %20 = math.exp %19 : vector<8x8xf32>
    %cst_10 = arith.constant dense<0.000000e+00> : vector<8xf32>
    %21 = vector.multi_reduction <add>, %20, %cst_10 [1] : vector<8x8xf32> to vector<8xf32>
    %22 = vector.shape_cast %21 : vector<8xf32> to vector<8x1xf32>
    %23 = tpu.reciprocal %22 {approx = true} : vector<8x1xf32> -> vector<8x1xf32>
    %24 = vector.broadcast %23 : vector<8x1xf32> to vector<8x8xf32>
    %25 = arith.mulf %20, %24 : vector<8x8xf32>
    %26 = arith.truncf %25 : vector<8x8xf32> to vector<8x8xbf16>
    %27 = arith.truncf %8 : vector<8x16xf32> to vector<8x16xbf16>
    %cst_11 = arith.constant dense<0.000000e+00> : vector<8x16xf32>
    %28 = tpu.matmul %26, %27, %cst_11 {dimension_numbers = #tpu.dot_dimension_numbers<[1], [0], [0], [1], [0, 0, 1, 1], [], []>} : vector<8x8xbf16>, vector<8x16xbf16>, vector<8x16xf32> -> vector<8x16xf32>
    %c0_12 = arith.constant 0 : index
    %c0_13 = arith.constant 0 : index
    %c0_14 = arith.constant 0 : index
    %29 = vector.load %arg4[%c0_12, %c0_13, %c0_14] : memref<1x8x16xf32, #tpu.memory_space<vmem>>, vector<1x8x16xf32>
    %30 = vector.shape_cast %29 : vector<1x8x16xf32> to vector<8x16xf32>
    %31 = vector.shape_cast %28 : vector<8x16xf32> to vector<1x8x16xf32>
    tpu.vector_store %arg4[%c0_12, %c0_13, %c0_14], %31 {strides = array<i32>} : memref<1x8x16xf32, #tpu.memory_space<vmem>>, vector<1x8x16xf32>,
    return
  }
  func.func @transform_0(%arg0: i32) -> (i32, i32, i32) {
    %c0_i32 = arith.constant 0 : i32
    %c0_i32_0 = arith.constant 0 : i32
    %c0_i32_1 = arith.constant 0 : i32
    return %arg0, %c0_i32, %c0_i32_0 : i32, i32, i32
  }
  func.func @transform_1(%arg0: i32) -> (i32, i32) {
    %c0_i32 = arith.constant 0 : i32
    %c0_i32_0 = arith.constant 0 : i32
    %c0_i32_1 = arith.constant 0 : i32
    return %c0_i32, %c0_i32_0 : i32, i32
  }
  func.func @transform_2(%arg0: i32) -> (i32, i32) {
    %c0_i32 = arith.constant 0 : i32
    %c0_i32_0 = arith.constant 0 : i32
    %c0_i32_1 = arith.constant 0 : i32
    return %c0_i32, %c0_i32_0 : i32, i32
  }
  func.func @transform_3(%arg0: i32) -> (i32, i32, i32) {
    %c0_i32 = arith.constant 0 : i32
    %c0_i32_0 = arith.constant 0 : i32
    %c0_i32_1 = arith.constant 0 : i32
    return %arg0, %c0_i32, %c0_i32_0 : i32, i32, i32
  }
}

</mosaic_0001>

<bundles_post_ra>
// kernel: tpu_custom_call.1
= control target key start
LH: loop header
LB: loop body
LE: loop exit
PB: predicated region body
PF: predicated region fallthrough
CT: control target
= control target key end

     0   :  { %8 = vsyncpa [#allocation3], 0  ;;  %s771_s0 = inlined_call_operand.vmem [shape: f32[2,8,32], index: 0, kind: input, shape index: {}]   ;;  %s772_s1 = inlined_call_operand.vmem [shape: f32[32,16], index: 1, kind: input, shape index: {}]   ;;  %s773_s2 = inlined_call_operand.vmem [shape: f32[32,16], index: 2, kind: input, shape index: {}]   ;;  %s774_s3 = inlined_call_operand.hbm [shape: f32[2,8,16], index: 3, kind: output, shape index: {}]  }
   0x1   :  { %10 = vsyncpa [#allocation3 + $0x1], 0  ;;  %s635_s12 = smov 0   ;;  %s637_s13 = smov 0  }
   0x2   :  { %s639_s14 = smov 0   ;;  %s641_s15 = smov 0  }
   0x3 LB: > { %s656_s16 = sadd.s32 4294967295, %s610_s15   ;;  %s451_s17 = sadd.s32 4294967294, %s610_s15   ;;  %s610_s15 = sphi %s641_s15, %s780_s15   ;;  %s606_s14 = sphi %s639_s14, %s779_s14   ;;  %s602_s13 = sphi %s637_s13, %s778_s13   ;;  %s598_s12 = sphi %s635_s12, %s777_s12  }
   0x4   : > { %s660_s18 = sadd.s32 1, %s610_s15   ;;  %s91_s19 = sadd.s32 1, %s606_s14 }
   0x5   : > { %s88_s20 = ssub.s32 %s610_s15, %s660_s18  ;;  %p101_p0 = scmp.ne.s32.totalorder %s606_s14, %s602_s13 }
   0x6   : > { %p89_p1 = scmp.eq.s32.totalorder %s88_s20, 0  ;;  %p102_p2 = scmp.eq.s32.totalorder %s656_s16, 1 }
   0x7   : > { %p107_p3 = scmp.ne.s32.totalorder %s602_s13, %s598_s12  ;;  %p108_p4 = scmp.eq.s32.totalorder %s451_s17, 1 }
   0x8   : > { %s671_s21 = scalar_select %p89_p1, %s606_s14, %s91_s19  }
   0x9   : > { %p673_p5 = por %p102_p2, %p101_p0  ;;  %p677_p6 = por %p108_p4, %p107_p3 }
   0xa   : > { %p454_p7 = scmp.ge.s32.totalorder %s610_s15, 1  ;;  %p139_p8 = scmp.lt.s32.totalorder %s610_s15, 3 }
   0xc   : > { %p140_p9 = pnand %p454_p7, %p139_p8 }
   0xd   : > { %v169_v0 = vld [vmem:[%s772_s1] sm:$0xff] (!%p140_p9)  ;;  %v170_v1 = vld [vmem:[%s772_s1 + $0x8] sm:$0xff] (!%p140_p9)  ;;  %v171_v2 = vld [vmem:[%s772_s1 + $0x10] sm:$0xff] (!%p140_p9)  ;;  %p162_p10 = scmp.lt.s32.totalorder (!%p140_p9), %s656_s16, 1  ;;  %v612_v3 = vmov (!%p140_p9), 0.0   ;;  %vm613_vm0 = vmmov (!%p140_p9), 0   ;;  %v310_v21 = vlaneseq (!%p140_p9) }
   0xe   : > { %143 = sbr.rel (%p140_p9) target bundleno = 1006 (0x3ee), region = 32  ;;  %475 = vmatprep.subr.bf16.mxu0 (!%p140_p9), %v612_v3  ;;  %v173_v4 = vpack.c.bf16 (!%p140_p9), %v170_v1, %v169_v0  ;;  %v172_v5 = vld [vmem:[%s772_s1 + $0x18] sm:$0xff] (!%p140_p9)  ;;  %479 = vmatprep.mubr.msk.bf16.mxu0 (!%p140_p9), %vm613_vm0, %v612_v3  ;;  %vm181_vm1 = vcmask (!%p140_p9), 261120   ;;  %vm266_vm2 = vcmask (!%p140_p9), 130048   ;;  %v175_v15 = vld [vmem:[%s773_s2] sm:$0xff] (!%p140_p9)  ;;  %v176_v16 = vld [vmem:[%s773_s2 + $0x8] sm:$0xff] (!%p140_p9) }
   0xf   : > { %483 = vmatprep.subr.bf16.mxu1 (!%p140_p9), %v612_v3  ;;  %487 = vmatprep.mubr.msk.bf16.mxu1 (!%p140_p9), %vm613_vm0, %v612_v3  ;;  %v174_v6 = vpack.c.bf16 (!%p140_p9), %v172_v5, %v171_v2  ;;  %v177_v17 = vld [vmem:[%s773_s2 + $0x10] sm:$0xff] (!%p140_p9)  ;;  %v179_v18 = vpack.c.bf16 (!%p140_p9), %v176_v16, %v175_v15  ;;  %v178_v19 = vld [vmem:[%s773_s2 + $0x18] sm:$0xff] (!%p140_p9)  ;;  %v311_v22 = vshrl.u32 (!%p140_p9), %v310_v21, 7  ;;  %v313_v23 = vand.u32 (!%p140_p9), 127, %v310_v21  ;;  %s159_s27 = sand.u32 (!%p140_p9), 1, %s602_s13   ;;  %s462_s29 = sshll.u32 (!%p140_p9), %s656_s16, 7 }
  0x10   : > { %476 = vmatpush3.bf16.msra.mxu0 (!%p140_p9), %v173_v4  ;;  %v180_v20 = vpack.c.bf16 (!%p140_p9), %v178_v19, %v177_v17  ;;  %vm316_vm4 = vcmask (!%p140_p9), 64512   ;;  %vm333_vm5 = vcmask (!%p140_p9), 1043456   ;;  %s455_s28 = sshll.u32 (!%p140_p9), %s159_s27, 3  ;;  %s728_s7 = scalar_lea.hbm (!%p140_p9), %s774_s3, %s462_s29 }
  0x11   : > { %477 = vmatprep.subr.bf16.mxu0 (!%p140_p9), %v612_v3  ;;  %484 = vmatpush3.bf16.msra.mxu1 (!%p140_p9), %v179_v18  ;;  %vm314_vm3 = vcmp.ge.s32.totalorder (!%p140_p9), %v311_v22, %v313_v23  ;;  %s161_s30 = scalar_lea.vmem (!%p140_p9), [#allocation2], %s455_s28  ;;  %s379_s8 = scalar_lea.sflag (!%p140_p9), [#allocation3], %s159_s27 }
  0x12   : > { %485 = vmatprep.subr.bf16.mxu1 (!%p140_p9), %v612_v3  ;;  %s392_s4 = sshll.u32 (!%p140_p9), %s161_s30, 4  ;;  %s730_s4 = int_to_ptr.vmem [resolvable:$true] %s392_s4 }
  0x14   : > { %478 = vmatpush3.bf16.msra.mxu0 (!%p140_p9), %v174_v6 }
  0x15   : > { %s163_s5 = scalar_select %p162_p10, %s656_s16, 1  ;;  %491 = vmatprep.subr.bf16.mxu0 %v612_v3  ;;  %486 = vmatpush3.bf16.msra.mxu1 %v180_v20 }
  0x16   : > { %497 = vmatprep.subr.bf16.mxu1 %v612_v3  ;;  %s614_s16 = smov [#allocation2]  }
  0x17   : > { %s456_s6 = sshll.u32 %s163_s5, 3  ;;  %s552_s10 = sshll.u32 %s614_s16, 4  ;;  %s553_s10 = int_to_ptr.vmem [resolvable:$false] %s552_s10 }
  0x18   : > { %s165_s9 = scalar_lea.vmem %s771_s0, %s456_s6  ;;  %s554_s11 = scalar_lea.vmem %s553_s10, 256 }
  0x19   : > { %v167_v7 = vld [vmem:[%s165_s9] sm:$0xff]  ;;  %s548_s9 = scalar_lea.vmem %s730_s4, 128  ;;  %p555_p0 = scmp.lt.s32.totalorder %s730_s4, %s553_s10 }
  0x1a   : > { %v168_v8 = vpack.c.bf16 %v167_v7, %v167_v7  ;;  %p549_p11 = scmp.ne.s32.totalorder %s730_s4, %s548_s9  ;;  %p556_p1 = scmp.lt.s32.totalorder %s554_s11, %s548_s9 }
  0x1c   : > { %480 = vmatmul.mubr.msk.bf16.vlgmr.msra.gmra.mrb[0].mxu0 %vm181_vm1, %v168_v8  ;;  %488 = vmatmul.mubr.msk.bf16.vlgmr.msra.gmra.mrb[0].mxu1 %vm181_vm1, %v168_v8  ;;  %p550_p12 = pnand %p549_p11, %p673_p5  ;;  %p557_p2 = por %p556_p1, %p555_p0 }
  0x1d   : > { %493 = vmatprep.mubr.msk.bf16.mxu0 %vm613_vm0, %v612_v3  ;;  %499 = vmatprep.mubr.msk.bf16.mxu1 %vm613_vm0, %v612_v3 }
  0x1e   : > { %p551_p13 = pneg %p550_p12 }
  0x20   : > { %p558_p3 = pnand %p557_p2, %p551_p13 }
  0xef   : > { %v219_v9 = vpop.f32.mrb[0].mxu0  ;;  %v259_v35 = vpop.f32.mrb[0].mxu1 }
  0xf0   : > { %v265_v10 = vpack.c.bf16 %v219_v9, %v219_v9  ;;  %v481_v11 = vpop.f32.mrb[1].mxu0  ;;  %v489_v36 = vpop.f32.mrb[1].mxu1  ;;  %v329_v39 = vpack.c.bf16 %v259_v35, %v259_v35 }
  0xf1   : > { %v222_v12 = vpop.f32.mrb[2].mxu0  ;;  %v262_v37 = vpop.f32.mrb[2].mxu1 }
  0xf2   : > { %v268_v13 = vsel %vm266_vm2, %v265_v10, 0  ;;  %v482_v14 = vpop.f32.mrb[3].mxu0  ;;  %v490_v38 = vpop.f32.mrb[3].mxu1  ;;  %v335_v40 = vsel %vm333_vm5, %v329_v39, 0 }
  0xf3   : > { %492 = vmatpush3.bf16.xpose.msra.mxu0 %v268_v13  ;;  %498 = vmatpush3.bf16.msra.mxu1 %v335_v40 }
  0xfa   : > { %494 = vmatmul.mubr.msk.bf16.vlgmr.msra.gmra.mrb[4].mxu0 %vm266_vm2, %v265_v10 }
 0x1cd   : > { %v304_v24 = vpop.f32.mrb[4].mxu0 }
 0x1ce   : > { %v315_v25 = vsel %vm314_vm3, %v304_v24, -1e+30  ;;  %v495_v26 = vpop.f32.mrb[5].mxu0 }
 0x1cf   : > { %v307_v27 = vpop.f32.mrb[6].mxu0  ;;  %v317_v28 = vsel %vm316_vm4, %v315_v25, -inf }
 0x1d0   : > { %318 = vmax.xlane.f32.xlu0 %v317_v28  ;;  %v496_v29 = vpop.f32.mrb[7].mxu0 }
 0x25d   : > { %v319_v30 = vpop.xlane.xlu0 %318 }
 0x25e   : > { %v320_v31 = vsub.f32 %v315_v25, %v319_v30 }
 0x260   : > { %v321_v32 = vmul.f32 1.442695, %v320_v31 }
 0x262   : > { %544 = vpow2.f32 %v321_v32 }
 0x26c   : > { %v545_v33 = vpop.eup %544 }
 0x26d   : > { %v323_v34 = vsel %vm316_vm4, %v545_v33, 0.0 }
 0x26e   : > { %324 = vadd.xlane.f32.xlu0 %v323_v34 }
 0x2fb   : > { %v325_v41 = vpop.xlane.xlu0 %324 }
 0x2fc   : > { %546 = vrcp.f32 %v325_v41 }
 0x306   : > { %v547_v42 = vpop.eup %546 }
 0x307   : > { %v327_v43 = vmul.f32 %v547_v42, %v545_v33 }
 0x309   : > { %v328_v44 = vpack.c.bf16 %v327_v43, %v327_v43 }
 0x30b   : > { %500 = vmatmul.mubr.msk.bf16.vlgmr.msra.gmra.mrb[4].mxu1 %vm316_vm4, %v328_v44 }
 0x3de   : > { %v371_v45 = vpop.f32.mrb[4].mxu1 }
 0x3df   : > { %377 = vst.msk [vmem:[%s161_s30] sm:$0xff] %vm266_vm2, %v371_v45  ;;  %v501_v46 = vpop.f32.mrb[5].mxu1 }
 0x3e0   : > { %v374_v47 = vpop.f32.mrb[6].mxu1 }
 0x3e1   : > { %561 = shalt.err (!%p558_p3)
}
 0x3e2   : > { %s562_s17 = scalar_lea.hbm %s728_s7, 128  ;;  %s566_s24 = scalar_lea.hbm %s774_s3, 256 }
 0x3e3   : > { %p563_p4 = scmp.ne.s32.totalorder %s728_s7, %s562_s17  ;;  %p567_p9 = scmp.lt.u32.totalorder %s728_s7, %s774_s3 }
 0x3e4   : > { %p568_p10 = scmp.lt.u32.totalorder %s566_s24, %s562_s17  ;;  %p570_p12 = scmp.lt.u32.totalorder %s562_s17, %s728_s7 }
 0x3e5   : > { %p564_p7 = pnand %p563_p4, %p673_p5 }
 0x3e6   : > { %p569_p11 = por %p568_p10, %p567_p9 }
 0x3e7   : > { %p565_p8 = pneg %p564_p7 }
 0x3e8   : > { %p571_p13 = por %p570_p12, %p569_p11 }
 0x3ea   : > { %p572_p0 = pnand %p571_p13, %p565_p8 }
 0x3ec   : > { %575 = shalt.err (!%p572_p0)
}
 0x3ed   : > { %503 = dma.vmem_to_hbm [thread:$0]  (%p673_p5), %s730_s4, 128, %s728_s7, %s379_s8   ;;  %v502_v48 = vpop.f32.mrb[7].mxu1 }
 0x3ee PF: > { %p509_p1 = scmp.ge.s32.totalorder %s610_s15, 2  ;;  %s404_s27 = sand.u32 1, %s598_s12  }
 0x3ef   : > { %s405_s28 = scalar_lea.sflag [#allocation3], %s404_s27 }
 0x3f0   : > { %p506_p2 = pnand %p509_p1, %p677_p6 }
 0x3f2   : > { %593 = dma.done.wait (!%p506_p2), %s405_s28, 128  }
 0x3f3   : > { %595 = vsyncadd (!%p506_p2), %s405_s28, 4294967168  ;;  %p13_p3 = scmp.ge.s32.totalorder %s660_s18, 4   ;;  %s777_s12 = smov %s602_s13 }
 0x3f4   : > { %s778_s13 = smov %s606_s14  ;;  %s779_s14 = smov %s671_s21 }
 0x3f5   : > { %s780_s15 = smov %s660_s18  ;;  %15 = sbr.rel (!%p13_p3) target bundleno = 3 (0x3), region = 67 }
 0x3fc   :  { %410 = vsyncpa [#allocation3], 1 }
 0x3fd   :  { %412 = vsyncpa [#allocation3 + $0x1], 1 }

</bundles_post_ra>
